<compile_context>
chip_gen: v7x
topology: tpu7x:2x2x1
jax: 0.10.0
libtpu: 0.0.40
codegen_flags: <defaults>
</compile_context>

<pallas_src>
import math

import jax
import jax.numpy as jnp
from jax import lax
from jax.experimental import pallas as pl
from jax.experimental.pallas import tpu as pltpu


# ---------------------------------------------------------------------------
# Kernel
# ---------------------------------------------------------------------------
def _make_downsample_kernel(bn, t_ho, wo, c):
    """One grid step computes `t_ho` output rows for `bn` batch images.

    ee_ref : (bn, t_ho, wo+1, c)  padded rows 2*oh   , even cols 0,2,..,2*wo
    eo_ref : (bn, t_ho, wo,   c)  padded rows 2*oh   , odd  cols 1,3,..,2*wo-1
    oe_ref : (bn, t_ho, wo+1, c)  padded rows 2*oh+1 , even cols
    oo_ref : (bn, t_ho, wo,   c)  padded rows 2*oh+1 , odd  cols
    eeh_ref: (bn, 1,    wo+1, c)  halo even row 2*(tile_end) , even cols
    eoh_ref: (bn, 1,    wo,   c)  halo even row             , odd  cols
    w_ref  : (9, c, c)            (kh*3+kw, Cin, Cout)
    b_ref  : (1, c) float32
    o_ref  : (bn, t_ho, wo, c)
    """
    m = bn * t_ho * wo

    def kernel(ee_ref, eo_ref, oe_ref, oo_ref, eeh_ref, eoh_ref,
               w_ref, b_ref, o_ref):
        ee = ee_ref[...]
        eo = eo_ref[...]
        oe = oe_ref[...]
        oo = oo_ref[...]
        eeh = eeh_ref[...]
        eoh = eoh_ref[...]

        # Row-shifted even arrays for the kh=2 taps (rows 2*oh+2): whole-plane
        # copies (no cross-lane relayout), halo row appended at the end.
        if t_ho > 1:
            ee2 = jnp.concatenate([ee[:, 1:], eeh], axis=1)
            eo2 = jnp.concatenate([eo[:, 1:], eoh], axis=1)
        else:
            ee2, eo2 = eeh, eoh

        def tap(src, kw):
            # Unit-offset static column slice only (no stride-2 gathers).
            if src.shape[2] == wo + 1:
                off = kw // 2                       # kw=0 -> 0 , kw=2 -> 1
                src = lax.slice_in_dim(src, off, off + wo, axis=2)
            return src.reshape(m, c)

        sources = ((ee, 0), (eo, 1), (ee, 2),       # kh = 0
                   (oe, 0), (oo, 1), (oe, 2),       # kh = 1
                   (ee2, 0), (eo2, 1), (ee2, 2))    # kh = 2

        acc = jnp.zeros((m, c), jnp.float32)
        # Build each tap immediately before its matmul: 1-2 taps live, not 9.
        for k, (src, kw) in enumerate(sources):
            acc = acc + jnp.dot(tap(src, kw), w_ref[k],
                                preferred_element_type=jnp.float32)
        acc = acc + b_ref[...]                       # (1, C) broadcasts
        o_ref[...] = acc.reshape(bn, t_ho, wo, c).astype(o_ref.dtype)

    return kernel


# ---------------------------------------------------------------------------
# Tiling heuristics
# ---------------------------------------------------------------------------
def _vmem_budget():
    """Generation-aware (v5e/v6e: 128 MiB, v7x: 64 MiB) VMEM budget."""
    cap = 64 * 1024 * 1024                      # conservative default (v7x TC)
    try:
        cap = int(pltpu.get_tpu_info().vmem_capacity_bytes)
    except Exception:
        pass
    limit = min((cap * 3) // 4, 100 * 1024 * 1024)
    limit = max(limit, 32 * 1024 * 1024)
    budget = min((limit * 11) // 20, 44 * 1024 * 1024)   # keep v7x headroom
    return budget, limit


def _live_bytes(bn, t, wo, c, isz, osz):
    """Conservative per-step VMEM live set (weights counted double-buffered)."""
    blk_in = bn * c * isz * (t * (4 * wo + 2) + (2 * wo + 1))   # 4 phases + halos
    blk_out = bn * t * wo * c * osz
    w_b = 2 * (9 * c * c * isz) + 2 * c * 4                     # w + bias, x2 buf
    interm = bn * t * c * isz * (4 * wo + 1) + bn * t * wo * c * 4
    return 2 * (blk_in + blk_out) + w_b + interm


def _pick_tiles(n, ho, wo, c, isz, osz, budget):
    """Pick (bn, t_ho): fill MXU M (~256), keep >=4 parallel steps, fit VMEM."""
    best, best_key = (1, 1), None
    for bn in [d for d in range(1, n + 1) if n % d == 0]:
        for t in range(1, ho + 1):
            if _live_bytes(bn, t, wo, c, isz, osz) > budget:
                break
            m = bn * t * wo
            nt = -(-ho // t)
            steps = (n // bn) * nt
            waste = nt * t - ho
            key = (min(m, 256),        # fill the 256-wide MXU M dimension
                   min(steps, 4),      # keep both v7x TensorCores busy
                   -steps,             # then: fewest grid steps (biggest tiles)
                   -waste,             # avoid padded/wasted rows
                   m)
            if best_key is None or key > best_key:
                best_key, best = key, (bn, t)
    return best


# ---------------------------------------------------------------------------
# Forward
# ---------------------------------------------------------------------------
def downsample_forward(x_nchw, weight_oihw, bias, temb=None, *,
                       compute_dtype=jnp.bfloat16, _tile_override=None):
    """Equivalent of DownSample.forward(x, temb): 3x3 / stride-2 / pad-1 conv."""
    del temb  # unused, exactly like the PyTorch module
    n, c, h, w = x_nchw.shape
    ho = (h + 1) // 2
    wo = (w + 1) // 2
    out_dtype = x_nchw.dtype
    cdt = jnp.dtype(compute_dtype) if compute_dtype is not None else jnp.dtype(out_dtype)
    isz = cdt.itemsize
    osz = jnp.dtype(out_dtype).itemsize

    budget, vmem_limit = _vmem_budget()
    if _tile_override is not None:
        bn, t_ho = _tile_override
    else:
        bn, t_ho = _pick_tiles(n, ho, wo, c, isz, osz, budget)
    nt = -(-ho // t_ho)
    ho_p = nt * t_ho                       # row-padded output height

    # --- one fused preprocessing pass: cast + transpose + pad + 2x2 split ---
    x = jnp.transpose(x_nchw.astype(cdt), (0, 2, 3, 1))          # (N, H, W, C)
    hp = 2 * ho_p + 2
    wp = 2 * wo + 2
    x = jnp.pad(x, ((0, 0), (1, hp - h - 1), (1, wp - w - 1), (0, 0)))
    x_ee = x[:, 0:2 * ho_p + 1:2, 0:2 * wo + 1:2, :]   # (N, ho_p+1, wo+1, C)
    x_eo = x[:, 0:2 * ho_p + 1:2, 1:2 * wo:2, :]       # (N, ho_p+1, wo,   C)
    x_oe = x[:, 1:2 * ho_p:2, 0:2 * wo + 1:2, :]       # (N, ho_p,   wo+1, C)
    x_oo = x[:, 1:2 * ho_p:2, 1:2 * wo:2, :]           # (N, ho_p,   wo,   C)
    ee_main = x_ee[:, :ho_p]                           # non-overlapping blocks
    eo_main = x_eo[:, :ho_p]
    ee_halo = x_ee[:, t_ho::t_ho]                      # (N, nt, wo+1, C)
    eo_halo = x_eo[:, t_ho::t_ho]                      # (N, nt, wo,   C)

    w_k = jnp.transpose(weight_oihw, (2, 3, 1, 0)).astype(cdt).reshape(9, c, c)
    b_2d = bias.reshape(1, c).astype(jnp.float32)

    kernel = _make_downsample_kernel(bn, t_ho, wo, c)

    out = pl.pallas_call(
        kernel,
        out_shape=jax.ShapeDtypeStruct((n, ho_p, wo, c), out_dtype),
        grid=(n // bn, nt),
        in_specs=[
            pl.BlockSpec((bn, t_ho, wo + 1, c), lambda i, t: (i, t, 0, 0)),
            pl.BlockSpec((bn, t_ho, wo, c), lambda i, t: (i, t, 0, 0)),
            pl.BlockSpec((bn, t_ho, wo + 1, c), lambda i, t: (i, t, 0, 0)),
            pl.BlockSpec((bn, t_ho, wo, c), lambda i, t: (i, t, 0, 0)),
            pl.BlockSpec((bn, 1, wo + 1, c), lambda i, t: (i, t, 0, 0)),
            pl.BlockSpec((bn, 1, wo, c), lambda i, t: (i, t, 0, 0)),
            # Weights/bias: constant index_map (fetched once, kept resident).
            # TODO(synk): single-buffer them via pipeline_mode=pl.Buffered(1)
            # once that is confirmed supported; counted x2 in the budget now.
            pl.BlockSpec((9, c, c), lambda i, t: (0, 0, 0)),
            pl.BlockSpec((1, c), lambda i, t: (0, 0)),
        ],
        out_specs=pl.BlockSpec((bn, t_ho, wo, c), lambda i, t: (i, t, 0, 0)),
        compiler_params=pltpu.CompilerParams(
            dimension_semantics=("parallel", "parallel"),
            vmem_limit_bytes=vmem_limit,
        ),
    )(ee_main, eo_main, x_oe, x_oo, ee_halo, eo_halo, w_k, b_2d)

    out = out[:, :ho]                                   # drop row padding
    return jnp.transpose(out, (0, 3, 1, 2))             # back to NCHW


# ---------------------------------------------------------------------------
# Params / reference / self-test
# ---------------------------------------------------------------------------
def init_downsample_params(key, in_ch):
    """Deterministic init matching nn.Conv2d + xavier_uniform_ / zeros_."""
    fan = in_ch * 3 * 3
    bound = math.sqrt(6.0 / (fan + fan))
    weight = jax.random.uniform(key, (in_ch, in_ch, 3, 3), jnp.float32,
                                minval=-bound, maxval=bound)   # OIHW
    bias = jnp.zeros((in_ch,), jnp.float32)
    return weight, bias


def _conv_ref(x, weight, bias, cast=None):
    if cast is not None:
        x = x.astype(cast).astype(jnp.float32)
        weight = weight.astype(cast).astype(jnp.float32)
    c = weight.shape[0]
    y = lax.conv_general_dilated(
        x.astype(jnp.float32), weight.astype(jnp.float32),
        window_strides=(2, 2), padding=((1, 1), (1, 1)),
        dimension_numbers=("NCHW", "OIHW", "NCHW"),
        preferred_element_type=jnp.float32)
    return y + bias.reshape(1, c, 1, 1)


if __name__ == "__main__":
    key = jax.random.PRNGKey(0)
    ks = jax.random.split(key, 12)

    # --- Test 1: module-sized shapes, default bf16 compute ------------------
    N, C, H, W = 2, 4, 16, 16
    x = jax.random.normal(ks[0], (N, C, H, W), jnp.float32)
    temb = jax.random.normal(ks[1], (N, 32), jnp.float32)     # ignored
    w1, _ = init_downsample_params(ks[2], C)
    b1 = 0.1 * jax.random.normal(ks[3], (C,), jnp.float32)
    y = jax.block_until_ready(downsample_forward(x, w1, b1, temb))
    y_ref = _conv_ref(x, w1, b1, cast=jnp.bfloat16)
    assert y.shape == (N, C, H // 2, W // 2)
    assert jnp.allclose(y, y_ref, atol=3e-2, rtol=3e-2)

    # --- Test 2: C=128, f32 compute path ------------------------------------
    N2, C2, H2, W2 = 1, 128, 8, 8
    x2 = jax.random.normal(ks[4], (N2, C2, H2, W2), jnp.float32)
    w2, _ = init_downsample_params(ks[5], C2)
    b2 = 0.1 * jax.random.normal(ks[6], (C2,), jnp.float32)
    y2 = jax.block_until_ready(
        downsample_forward(x2, w2, b2, None, compute_dtype=jnp.float32))
    y2_ref = _conv_ref(x2, w2, b2)
    assert y2.shape == (N2, C2, H2 // 2, W2 // 2)
    assert jnp.allclose(y2, y2_ref, atol=3e-2, rtol=3e-2)

    # --- Test 3: odd H/W + forced multi-tile grid (halo + row-padding path) --
    N3, C3, H3, W3 = 1, 8, 11, 9          # ho=6, wo=5 ; force t_ho=4 -> nt=2
    x3 = jax.random.normal(ks[7], (N3, C3, H3, W3), jnp.float32)
    w3, _ = init_downsample_params(ks[8], C3)
    b3 = 0.1 * jax.random.normal(ks[9], (C3,), jnp.float32)
    y3 = jax.block_until_ready(
        downsample_forward(x3, w3, b3, None, compute_dtype=jnp.float32,
                           _tile_override=(1, 4)))
    y3_ref = _conv_ref(x3, w3, b3)
    assert y3.shape == (N3, C3, (H3 + 1) // 2, (W3 + 1) // 2)
    assert jnp.allclose(y3, y3_ref, atol=3e-2, rtol=3e-2)

    print("KERNEL_OK")
</pallas_src>

<mosaic_0001>
module attributes {stable_mosaic.version = 11 : i64} {
  func.func @kernel(%arg0: i32, %arg1: i32, %arg2: memref<2x8x9x4xbf16, #tpu.memory_space<vmem>>, %arg3: memref<2x8x8x4xbf16, #tpu.memory_space<vmem>>, %arg4: memref<2x8x9x4xbf16, #tpu.memory_space<vmem>>, %arg5: memref<2x8x8x4xbf16, #tpu.memory_space<vmem>>, %arg6: memref<2x1x9x4xbf16, #tpu.memory_space<vmem>>, %arg7: memref<2x1x8x4xbf16, #tpu.memory_space<vmem>>, %arg8: memref<9x4x4xbf16, #tpu.memory_space<vmem>>, %arg9: memref<1x4xf32, #tpu.memory_space<vmem>>, %arg10: memref<2x8x8x4xf32, #tpu.memory_space<vmem>>) attributes {dimension_semantics = [#tpu.dimension_semantics<parallel>, #tpu.dimension_semantics<parallel>], iteration_bounds = array<i64: 1, 1>, scalar_prefetch = 0 : i64, scratch_operands = 0 : i64, tpu.core_type = #tpu.core_type<tc>, window_params = [{transform_indices = @transform_0, window_bounds = array<i64: 2, 8, 9, 4>}, {transform_indices = @transform_1, window_bounds = array<i64: 2, 8, 8, 4>}, {transform_indices = @transform_2, window_bounds = array<i64: 2, 8, 9, 4>}, {transform_indices = @transform_3, window_bounds = array<i64: 2, 8, 8, 4>}, {transform_indices = @transform_4, window_bounds = array<i64: 2, 1, 9, 4>}, {transform_indices = @transform_5, window_bounds = array<i64: 2, 1, 8, 4>}, {pipeline_mode = #tpu.pipeline_mode<synchronous>, transform_indices = @transform_6, window_bounds = array<i64: 9, 4, 4>}, {pipeline_mode = #tpu.pipeline_mode<synchronous>, transform_indices = @transform_7, window_bounds = array<i64: 1, 4>}, {transform_indices = @transform_8, window_bounds = array<i64: 2, 8, 8, 4>}]} {
    %c0 = arith.constant 0 : index
    %c0_0 = arith.constant 0 : index
    %c0_1 = arith.constant 0 : index
    %c0_2 = arith.constant 0 : index
    %0 = vector.load %arg2[%c0, %c0_0, %c0_1, %c0_2] : memref<2x8x9x4xbf16, #tpu.memory_space<vmem>>, vector<2x8x9x4xbf16>
    %c0_3 = arith.constant 0 : index
    %c0_4 = arith.constant 0 : index
    %c0_5 = arith.constant 0 : index
    %c0_6 = arith.constant 0 : index
    %1 = vector.load %arg3[%c0_3, %c0_4, %c0_5, %c0_6] : memref<2x8x8x4xbf16, #tpu.memory_space<vmem>>, vector<2x8x8x4xbf16>
    %c0_7 = arith.constant 0 : index
    %c0_8 = arith.constant 0 : index
    %c0_9 = arith.constant 0 : index
    %c0_10 = arith.constant 0 : index
    %2 = vector.load %arg4[%c0_7, %c0_8, %c0_9, %c0_10] : memref<2x8x9x4xbf16, #tpu.memory_space<vmem>>, vector<2x8x9x4xbf16>
    %c0_11 = arith.constant 0 : index
    %c0_12 = arith.constant 0 : index
    %c0_13 = arith.constant 0 : index
    %c0_14 = arith.constant 0 : index
    %3 = vector.load %arg5[%c0_11, %c0_12, %c0_13, %c0_14] : memref<2x8x8x4xbf16, #tpu.memory_space<vmem>>, vector<2x8x8x4xbf16>
    %c0_15 = arith.constant 0 : index
    %c0_16 = arith.constant 0 : index
    %c0_17 = arith.constant 0 : index
    %c0_18 = arith.constant 0 : index
    %4 = vector.load %arg6[%c0_15, %c0_16, %c0_17, %c0_18] : memref<2x1x9x4xbf16, #tpu.memory_space<vmem>>, vector<2x1x9x4xbf16>
    %c0_19 = arith.constant 0 : index
    %c0_20 = arith.constant 0 : index
    %c0_21 = arith.constant 0 : index
    %c0_22 = arith.constant 0 : index
    %5 = vector.load %arg7[%c0_19, %c0_20, %c0_21, %c0_22] : memref<2x1x8x4xbf16, #tpu.memory_space<vmem>>, vector<2x1x8x4xbf16>
    %6 = vector.extract_strided_slice %0 {offsets = [0, 1, 0, 0], sizes = [2, 7, 9, 4], strides = [1, 1, 1, 1]} : vector<2x8x9x4xbf16> to vector<2x7x9x4xbf16>
    %7 = tpu.concatenate %6, %4 in 1 : vector<2x7x9x4xbf16>, vector<2x1x9x4xbf16> -> vector<2x8x9x4xbf16>
    %8 = vector.extract_strided_slice %1 {offsets = [0, 1, 0, 0], sizes = [2, 7, 8, 4], strides = [1, 1, 1, 1]} : vector<2x8x8x4xbf16> to vector<2x7x8x4xbf16>
    %9 = tpu.concatenate %8, %5 in 1 : vector<2x7x8x4xbf16>, vector<2x1x8x4xbf16> -> vector<2x8x8x4xbf16>
    %cst = arith.constant 0.000000e+00 : f32
    %10 = vector.broadcast %cst : f32 to vector<128x4xf32>
    %11 = vector.extract_strided_slice %0 {offsets = [0, 0, 0, 0], sizes = [2, 8, 8, 4], strides = [1, 1, 1, 1]} : vector<2x8x9x4xbf16> to vector<2x8x8x4xbf16>
    %12 = vector.shape_cast %11 : vector<2x8x8x4xbf16> to vector<128x4xbf16>
    %c0_23 = arith.constant 0 : index
    %c0_24 = arith.constant 0 : index
    %c0_25 = arith.constant 0 : index
    %13 = vector.load %arg8[%c0_23, %c0_24, %c0_25] : memref<9x4x4xbf16, #tpu.memory_space<vmem>>, vector<1x4x4xbf16>
    %14 = vector.shape_cast %13 : vector<1x4x4xbf16> to vector<4x4xbf16>
    %cst_26 = arith.constant dense<0.000000e+00> : vector<128x4xf32>
    %15 = tpu.matmul %12, %14, %cst_26 {dimension_numbers = #tpu.dot_dimension_numbers<[1], [0], [0], [1], [0, 0, 1, 1], [], []>} : vector<128x4xbf16>, vector<4x4xbf16>, vector<128x4xf32> -> vector<128x4xf32>
    %16 = arith.addf %10, %15 : vector<128x4xf32>
    %17 = vector.shape_cast %1 : vector<2x8x8x4xbf16> to vector<128x4xbf16>
    %c1 = arith.constant 1 : index
    %c0_27 = arith.constant 0 : index
    %c0_28 = arith.constant 0 : index
    %18 = vector.load %arg8[%c1, %c0_27, %c0_28] : memref<9x4x4xbf16, #tpu.memory_space<vmem>>, vector<1x4x4xbf16>
    %19 = vector.shape_cast %18 : vector<1x4x4xbf16> to vector<4x4xbf16>
    %cst_29 = arith.constant dense<0.000000e+00> : vector<128x4xf32>
    %20 = tpu.matmul %17, %19, %cst_29 {dimension_numbers = #tpu.dot_dimension_numbers<[1], [0], [0], [1], [0, 0, 1, 1], [], []>} : vector<128x4xbf16>, vector<4x4xbf16>, vector<128x4xf32> -> vector<128x4xf32>
    %21 = arith.addf %16, %20 : vector<128x4xf32>
    %22 = vector.extract_strided_slice %0 {offsets = [0, 0, 1, 0], sizes = [2, 8, 8, 4], strides = [1, 1, 1, 1]} : vector<2x8x9x4xbf16> to vector<2x8x8x4xbf16>
    %23 = vector.shape_cast %22 : vector<2x8x8x4xbf16> to vector<128x4xbf16>
    %c2 = arith.constant 2 : index
    %c0_30 = arith.constant 0 : index
    %c0_31 = arith.constant 0 : index
    %24 = vector.load %arg8[%c2, %c0_30, %c0_31] : memref<9x4x4xbf16, #tpu.memory_space<vmem>>, vector<1x4x4xbf16>
    %25 = vector.shape_cast %24 : vector<1x4x4xbf16> to vector<4x4xbf16>
    %cst_32 = arith.constant dense<0.000000e+00> : vector<128x4xf32>
    %26 = tpu.matmul %23, %25, %cst_32 {dimension_numbers = #tpu.dot_dimension_numbers<[1], [0], [0], [1], [0, 0, 1, 1], [], []>} : vector<128x4xbf16>, vector<4x4xbf16>, vector<128x4xf32> -> vector<128x4xf32>
    %27 = arith.addf %21, %26 : vector<128x4xf32>
    %28 = vector.extract_strided_slice %2 {offsets = [0, 0, 0, 0], sizes = [2, 8, 8, 4], strides = [1, 1, 1, 1]} : vector<2x8x9x4xbf16> to vector<2x8x8x4xbf16>
    %29 = vector.shape_cast %28 : vector<2x8x8x4xbf16> to vector<128x4xbf16>
    %c3 = arith.constant 3 : index
    %c0_33 = arith.constant 0 : index
    %c0_34 = arith.constant 0 : index
    %30 = vector.load %arg8[%c3, %c0_33, %c0_34] : memref<9x4x4xbf16, #tpu.memory_space<vmem>>, vector<1x4x4xbf16>
    %31 = vector.shape_cast %30 : vector<1x4x4xbf16> to vector<4x4xbf16>
    %cst_35 = arith.constant dense<0.000000e+00> : vector<128x4xf32>
    %32 = tpu.matmul %29, %31, %cst_35 {dimension_numbers = #tpu.dot_dimension_numbers<[1], [0], [0], [1], [0, 0, 1, 1], [], []>} : vector<128x4xbf16>, vector<4x4xbf16>, vector<128x4xf32> -> vector<128x4xf32>
    %33 = arith.addf %27, %32 : vector<128x4xf32>
    %34 = vector.shape_cast %3 : vector<2x8x8x4xbf16> to vector<128x4xbf16>
    %c4 = arith.constant 4 : index
    %c0_36 = arith.constant 0 : index
    %c0_37 = arith.constant 0 : index
    %35 = vector.load %arg8[%c4, %c0_36, %c0_37] : memref<9x4x4xbf16, #tpu.memory_space<vmem>>, vector<1x4x4xbf16>
    %36 = vector.shape_cast %35 : vector<1x4x4xbf16> to vector<4x4xbf16>
    %cst_38 = arith.constant dense<0.000000e+00> : vector<128x4xf32>
    %37 = tpu.matmul %34, %36, %cst_38 {dimension_numbers = #tpu.dot_dimension_numbers<[1], [0], [0], [1], [0, 0, 1, 1], [], []>} : vector<128x4xbf16>, vector<4x4xbf16>, vector<128x4xf32> -> vector<128x4xf32>
    %38 = arith.addf %33, %37 : vector<128x4xf32>
    %39 = vector.extract_strided_slice %2 {offsets = [0, 0, 1, 0], sizes = [2, 8, 8, 4], strides = [1, 1, 1, 1]} : vector<2x8x9x4xbf16> to vector<2x8x8x4xbf16>
    %40 = vector.shape_cast %39 : vector<2x8x8x4xbf16> to vector<128x4xbf16>
    %c5 = arith.constant 5 : index
    %c0_39 = arith.constant 0 : index
    %c0_40 = arith.constant 0 : index
    %41 = vector.load %arg8[%c5, %c0_39, %c0_40] : memref<9x4x4xbf16, #tpu.memory_space<vmem>>, vector<1x4x4xbf16>
    %42 = vector.shape_cast %41 : vector<1x4x4xbf16> to vector<4x4xbf16>
    %cst_41 = arith.constant dense<0.000000e+00> : vector<128x4xf32>
    %43 = tpu.matmul %40, %42, %cst_41 {dimension_numbers = #tpu.dot_dimension_numbers<[1], [0], [0], [1], [0, 0, 1, 1], [], []>} : vector<128x4xbf16>, vector<4x4xbf16>, vector<128x4xf32> -> vector<128x4xf32>
    %44 = arith.addf %38, %43 : vector<128x4xf32>
    %45 = vector.extract_strided_slice %7 {offsets = [0, 0, 0, 0], sizes = [2, 8, 8, 4], strides = [1, 1, 1, 1]} : vector<2x8x9x4xbf16> to vector<2x8x8x4xbf16>
    %46 = vector.shape_cast %45 : vector<2x8x8x4xbf16> to vector<128x4xbf16>
    %c6 = arith.constant 6 : index
    %c0_42 = arith.constant 0 : index
    %c0_43 = arith.constant 0 : index
    %47 = vector.load %arg8[%c6, %c0_42, %c0_43] : memref<9x4x4xbf16, #tpu.memory_space<vmem>>, vector<1x4x4xbf16>
    %48 = vector.shape_cast %47 : vector<1x4x4xbf16> to vector<4x4xbf16>
    %cst_44 = arith.constant dense<0.000000e+00> : vector<128x4xf32>
    %49 = tpu.matmul %46, %48, %cst_44 {dimension_numbers = #tpu.dot_dimension_numbers<[1], [0], [0], [1], [0, 0, 1, 1], [], []>} : vector<128x4xbf16>, vector<4x4xbf16>, vector<128x4xf32> -> vector<128x4xf32>
    %50 = arith.addf %44, %49 : vector<128x4xf32>
    %51 = vector.shape_cast %9 : vector<2x8x8x4xbf16> to vector<128x4xbf16>
    %c7 = arith.constant 7 : index
    %c0_45 = arith.constant 0 : index
    %c0_46 = arith.constant 0 : index
    %52 = vector.load %arg8[%c7, %c0_45, %c0_46] : memref<9x4x4xbf16, #tpu.memory_space<vmem>>, vector<1x4x4xbf16>
    %53 = vector.shape_cast %52 : vector<1x4x4xbf16> to vector<4x4xbf16>
    %cst_47 = arith.constant dense<0.000000e+00> : vector<128x4xf32>
    %54 = tpu.matmul %51, %53, %cst_47 {dimension_numbers = #tpu.dot_dimension_numbers<[1], [0], [0], [1], [0, 0, 1, 1], [], []>} : vector<128x4xbf16>, vector<4x4xbf16>, vector<128x4xf32> -> vector<128x4xf32>
    %55 = arith.addf %50, %54 : vector<128x4xf32>
    %56 = vector.extract_strided_slice %7 {offsets = [0, 0, 1, 0], sizes = [2, 8, 8, 4], strides = [1, 1, 1, 1]} : vector<2x8x9x4xbf16> to vector<2x8x8x4xbf16>
    %57 = vector.shape_cast %56 : vector<2x8x8x4xbf16> to vector<128x4xbf16>
    %c8 = arith.constant 8 : index
    %c0_48 = arith.constant 0 : index
    %c0_49 = arith.constant 0 : index
    %58 = vector.load %arg8[%c8, %c0_48, %c0_49] : memref<9x4x4xbf16, #tpu.memory_space<vmem>>, vector<1x4x4xbf16>
    %59 = vector.shape_cast %58 : vector<1x4x4xbf16> to vector<4x4xbf16>
    %cst_50 = arith.constant dense<0.000000e+00> : vector<128x4xf32>
    %60 = tpu.matmul %57, %59, %cst_50 {dimension_numbers = #tpu.dot_dimension_numbers<[1], [0], [0], [1], [0, 0, 1, 1], [], []>} : vector<128x4xbf16>, vector<4x4xbf16>, vector<128x4xf32> -> vector<128x4xf32>
    %61 = arith.addf %55, %60 : vector<128x4xf32>
    %c0_51 = arith.constant 0 : index
    %c0_52 = arith.constant 0 : index
    %62 = vector.load %arg9[%c0_51, %c0_52] : memref<1x4xf32, #tpu.memory_space<vmem>>, vector<1x4xf32>
    %63 = vector.broadcast %62 : vector<1x4xf32> to vector<128x4xf32>
    %64 = arith.addf %61, %63 : vector<128x4xf32>
    %65 = vector.shape_cast %64 : vector<128x4xf32> to vector<2x8x8x4xf32>
    %c0_53 = arith.constant 0 : index
    %c0_54 = arith.constant 0 : index
    %c0_55 = arith.constant 0 : index
    %c0_56 = arith.constant 0 : index
    %66 = vector.load %arg10[%c0_53, %c0_54, %c0_55, %c0_56] : memref<2x8x8x4xf32, #tpu.memory_space<vmem>>, vector<2x8x8x4xf32>
    tpu.vector_store %arg10[%c0_53, %c0_54, %c0_55, %c0_56], %65 {strides = array<i32>} : memref<2x8x8x4xf32, #tpu.memory_space<vmem>>, vector<2x8x8x4xf32>,
    return
  }
  func.func @transform_0(%arg0: i32, %arg1: i32) -> (i32, i32, i32, i32) {
    %c0_i32 = arith.constant 0 : i32
    %c0_i32_0 = arith.constant 0 : i32
    %c0_i32_1 = arith.constant 0 : i32
    return %arg0, %arg1, %c0_i32, %c0_i32_0 : i32, i32, i32, i32
  }
  func.func @transform_1(%arg0: i32, %arg1: i32) -> (i32, i32, i32, i32) {
    %c0_i32 = arith.constant 0 : i32
    %c0_i32_0 = arith.constant 0 : i32
    %c0_i32_1 = arith.constant 0 : i32
    return %arg0, %arg1, %c0_i32, %c0_i32_0 : i32, i32, i32, i32
  }
  func.func @transform_2(%arg0: i32, %arg1: i32) -> (i32, i32, i32, i32) {
    %c0_i32 = arith.constant 0 : i32
    %c0_i32_0 = arith.constant 0 : i32
    %c0_i32_1 = arith.constant 0 : i32
    return %arg0, %arg1, %c0_i32, %c0_i32_0 : i32, i32, i32, i32
  }
  func.func @transform_3(%arg0: i32, %arg1: i32) -> (i32, i32, i32, i32) {
    %c0_i32 = arith.constant 0 : i32
    %c0_i32_0 = arith.constant 0 : i32
    %c0_i32_1 = arith.constant 0 : i32
    return %arg0, %arg1, %c0_i32, %c0_i32_0 : i32, i32, i32, i32
  }
  func.func @transform_4(%arg0: i32, %arg1: i32) -> (i32, i32, i32, i32) {
    %c0_i32 = arith.constant 0 : i32
    %c0_i32_0 = arith.constant 0 : i32
    %c0_i32_1 = arith.constant 0 : i32
    return %arg0, %arg1, %c0_i32, %c0_i32_0 : i32, i32, i32, i32
  }
  func.func @transform_5(%arg0: i32, %arg1: i32) -> (i32, i32, i32, i32) {
    %c0_i32 = arith.constant 0 : i32
    %c0_i32_0 = arith.constant 0 : i32
    %c0_i32_1 = arith.constant 0 : i32
    return %arg0, %arg1, %c0_i32, %c0_i32_0 : i32, i32, i32, i32
  }
  func.func @transform_6(%arg0: i32, %arg1: i32) -> (i32, i32, i32) {
    %c0_i32 = arith.constant 0 : i32
    %c0_i32_0 = arith.constant 0 : i32
    %c0_i32_1 = arith.constant 0 : i32
    %c0_i32_2 = arith.constant 0 : i32
    return %c0_i32, %c0_i32_0, %c0_i32_1 : i32, i32, i32
  }
  func.func @transform_7(%arg0: i32, %arg1: i32) -> (i32, i32) {
    %c0_i32 = arith.constant 0 : i32
    %c0_i32_0 = arith.constant 0 : i32
    %c0_i32_1 = arith.constant 0 : i32
    return %c0_i32, %c0_i32_0 : i32, i32
  }
  func.func @transform_8(%arg0: i32, %arg1: i32) -> (i32, i32, i32, i32) {
    %c0_i32 = arith.constant 0 : i32
    %c0_i32_0 = arith.constant 0 : i32
    %c0_i32_1 = arith.constant 0 : i32
    return %arg0, %arg1, %c0_i32, %c0_i32_0 : i32, i32, i32, i32
  }
}

</mosaic_0001>

<bundles_post_ra>
// kernel: tpu_custom_call.1
= control target key start
LH: loop header
LB: loop body
LE: loop exit
PB: predicated region body
PF: predicated region fallthrough
CT: control target
= control target key end

     0   :  { %vm200_vm0 = vcmask 1041408   ;;  %vm175_vm1 = vcmask 31744   ;;  %vm465_vm2 = vsmask.f32 3328  ;;  %vm466_vm3 = vsmask.f32 7440  ;;  %s3724_s6 = inlined_call_operand.vmem [shape: bf16[9,4,4], index: 6, kind: input, shape index: {}]   ;;  %s3725_s1 = inlined_call_operand.vmem [shape: bf16[2,8,8,4], index: 1, kind: input, shape index: {}]   ;;  %s3726_s3 = inlined_call_operand.vmem [shape: bf16[2,8,8,4], index: 3, kind: input, shape index: {}]   ;;  %s3727_s2 = inlined_call_operand.vmem [shape: bf16[2,8,9,4], index: 2, kind: input, shape index: {}]   ;;  %s3728_s0 = inlined_call_operand.vmem [shape: bf16[2,8,9,4], index: 0, kind: input, shape index: {}]   ;;  %s3729_s4 = inlined_call_operand.vmem [shape: bf16[2,1,9,4], index: 4, kind: input, shape index: {}]   ;;  %s3730_s5 = inlined_call_operand.vmem [shape: bf16[2,1,8,4], index: 5, kind: input, shape index: {}]   ;;  %s3731_s7 = inlined_call_operand.vmem [shape: f32[1,4], index: 7, kind: input, shape index: {}]   ;;  %s3732_s8 = inlined_call_operand.vmem [shape: f32[2,8,8,4], index: 8, kind: output, shape index: {}]  }
   0x1   :  { %v2143_v0 = vld [vmem:[%s3724_s6 + $0x2] sm:$0x3]  ;;  %v2774_v1 = vld [vmem:[%s3724_s6 + $0x8] sm:$0x3]  ;;  %v2790_v5 = vld [vmem:[%s3725_s1 + $0x4] sm:$0xf] }
   0x2   :  { %v62_v2 = vld [vmem:[%s3725_s1] sm:$0xf]  ;;  %2669 = vmatprep.subr.msk.bf16.mxu1 %vm200_vm0, %v2143_v0  ;;  %2673 = vmatprep.subr.msk.bf16.mxu0 %vm200_vm0, %v2774_v1  ;;  %v202_v3 = vsel %vm200_vm0, %v2143_v0, 0  ;;  %v2785_v4 = vsel %vm200_vm0, %v2774_v1, 0  ;;  %v2795_v6 = vld [vmem:[%s3725_s1 + $0x8] sm:$0xf]  ;;  %vm2932_vm4 = vmor %vm465_vm2, %vm466_vm3 }
   0x3   :  { %2378 = vmatpush3.bf16.msra.mxu1 %v202_v3  ;;  %2450 = vmatpush3.bf16.msra.mxu0 %v2785_v4  ;;  %v2801_v7 = vld [vmem:[%s3725_s1 + $0xc] sm:$0xf]  ;;  %v2806_v8 = vld [vmem:[%s3725_s1 + $0x10] sm:$0xf]  ;;  %v2144_v9 = vcombine.low %v62_v2, %v2790_v5  ;;  %v2683_v13 = vld [vmem:[%s3726_s3] sm:$0xff]  }
   0x4   :  { %v2145_v11 = vcombine.low %v2795_v6, %v2801_v7  ;;  %v132_v14 = vld [vmem:[%s3724_s6] sm:$0x3]  ;;  %v2684_v15 = vld [vmem:[%s3726_s3 + $0x8] sm:$0xff]   ;;  %2451 = vmatprep.mubr.msk.bf16.mxu0 %vm175_vm1, %v2683_v13  ;;  %v2835_v18 = vld [vmem:[%s3725_s1 + $0x14] sm:$0xf] }
   0x5   :  { %2379 = vmatprep.mubr.msk.bf16.mxu1 %vm175_vm1, %v2144_v9  ;;  %2670 = vmatprep.subr.msk.bf16.mxu1 %vm200_vm0, %v132_v14  ;;  %v366_v16 = vsel %vm200_vm0, %v132_v14, 0  ;;  %v2227_v17 = vld [vmem:[%s3724_s6 + $0xa] sm:$0x3]  ;;  %v2146_v20 = vcombine.low %v2806_v8, %v2835_v18  ;;  %v2686_v21 = vld [vmem:[%s3726_s3 + $0x10] sm:$0xff]   ;;  %v2848_v22 = vld [vmem:[%s3725_s1 + $0x18] sm:$0xf] }
   0x6   :  { %2380 = vmatmul.mubr.msk.bf16.vlgmr.msra.gmra.mrb[0].mxu1 %vm175_vm1, %v2145_v11  ;;  %2452 = vmatmul.mubr.msk.bf16.vlgmr.msra.gmra.mrb[0].mxu0 %vm175_vm1, %v2684_v15  ;;  %v1497_v19 = vsel %vm200_vm0, %v2227_v17, 0  ;;  %v2853_v23 = vld [vmem:[%s3725_s1 + $0x1c] sm:$0xf]  ;;  %v70_v26 = vld [vmem:[%s3725_s1 + $0x20] sm:$0xf] }
   0x7   :  { %2675 = vmatprep.subr.msk.bf16.mxu0 %vm200_vm0, %v2227_v17  ;;  %2396 = vmatpush3.bf16.msra.mxu1 %v366_v16  ;;  %v2688_v25 = vld [vmem:[%s3726_s3 + $0x18] sm:$0xff]   ;;  %v2868_v27 = vld [vmem:[%s3725_s1 + $0x24] sm:$0xf]  ;;  %v2147_v28 = vcombine.low %v2848_v22, %v2853_v23  ;;  %v2876_v30 = vld [vmem:[%s3727_s2] sm:$0xf] }
   0x8   :  { %2468 = vmatpush3.bf16.msra.mxu0 %v1497_v19  ;;  %2383 = vmatprep.mubr.msk.bf16.mxu1 %vm175_vm1, %v2146_v20  ;;  %v2148_v29 = vcombine.low %v70_v26, %v2868_v27  ;;  %v79_v31 = vld [vmem:[%s3727_s2 + $0x4] sm:$0x1]  ;;  %v2884_v32 = vld [vmem:[%s3727_s2 + $0x8] sm:$0xf]  ;;  %v81_v33 = vld [vmem:[%s3727_s2 + $0xc] sm:$0x1] }
   0x9   :  { %2455 = vmatprep.mubr.msk.bf16.mxu0 %vm175_vm1, %v2686_v21  ;;  %v1223_v34 = vshrl.u32 %v2876_v30, 16  ;;  %v1226_v35 = vshll.u32 %v2876_v30, 16  ;;  %v1232_v36 = vshll.u32 %v79_v31, 16  ;;  %v1237_v37 = vshrl.u32 %v2884_v32, 16  ;;  %v2896_v40 = vld [vmem:[%s3725_s1 + $0x28] sm:$0xf] }
   0xa   :  { %v1240_v38 = vshll.u32 %v2884_v32, 16  ;;  %v1246_v39 = vshll.u32 %v81_v33, 16  ;;  %3745 = vst [vmem:[#allocation2_spill] sm:$0xff] %v2896_v40  ;;  %v2901_v41 = vld [vmem:[%s3725_s1 + $0x2c] sm:$0xf]  ;;  %v2722_v59 = vld [vmem:[%s3726_s3 + $0x38] sm:$0xff]  }
   0xb   :  { %3746 = vst [vmem:[#allocation3_spill] sm:$0xff] %v2901_v41  ;;  %v1225_v43 = vrot.slane %v1223_v34, 4  ;;  %v1228_v44 = vrot.slane %v1226_v35, 5  ;;  %v1234_v45 = vrot.slane %v1232_v36, 5  ;;  %v1239_v46 = vrot.slane %v1237_v37, 4 }
   0xc   :  { %v2908_v47 = vld [vmem:[%s3727_s2 + $0x10] sm:$0xf]  ;;  %v1242_v48 = vrot.slane %v1240_v38, 5  ;;  %v1248_v49 = vrot.slane %v1246_v39, 5  ;;  %v2149_v50 = vcombine.low %v2896_v40, %v2901_v41  ;;  %v83_v51 = vld [vmem:[%s3727_s2 + $0x14] sm:$0x1] }
   0xd   :  { %v2919_v52 = vld [vmem:[%s3727_s2 + $0x18] sm:$0xf]  ;;  %v1229_v54 = vor.u32 %v1228_v44, %v1225_v43  ;;  %v85_v55 = vld [vmem:[%s3727_s2 + $0x1c] sm:$0x1]  ;;  %v1251_v56 = vshrl.u32 %v2908_v47, 16  ;;  %v1254_v57 = vshll.u32 %v2908_v47, 16 }
   0xe   :  { %2384 = vmatmul.mubr.msk.bf16.gmra.mrb[4].mxu1 %vm175_vm1, %v2147_v28  ;;  %2456 = vmatmul.mubr.msk.bf16.gmra.mrb[4].mxu0 %vm175_vm1, %v2688_v25  ;;  %v1260_v58 = vshll.u32 %v83_v51, 16  ;;  %v1243_v60 = vor.u32 %v1242_v48, %v1239_v46  ;;  %v1265_v61 = vshrl.u32 %v2919_v52, 16  ;;  %v1268_v62 = vshll.u32 %v2919_v52, 16  ;;  %v2244_v0 = vld [vmem:[%s3724_s6 + $0xc] sm:$0x3] }
   0xf   :  { %2387 = vmatprep.mubr.msk.bf16.mxu1 %vm175_vm1, %v2148_v29  ;;  %v1274_v63 = vshll.u32 %v85_v55, 16  ;;  %v1230_v2 = vrot.slane %v1229_v54, 4  ;;  %v1253_v3 = vrot.slane %v1251_v56, 4  ;;  %v1256_v9 = vrot.slane %v1254_v57, 5  ;;  %2676 = vmatprep.subr.msk.bf16.mxu0 %vm200_vm0, %v2244_v0  ;;  %v2945_v13 = vld [vmem:[%s3725_s1 + $0x30] sm:$0xf] }
  0x10   :  { %v1262_v11 = vrot.slane %v1260_v58, 5  ;;  %3749 = vst [vmem:[#allocation4_spill] sm:$0xff] %v2945_v13  ;;  %v1244_v14 = vrot.slane %v1243_v60, 4  ;;  %v1267_v15 = vrot.slane %v1265_v61, 4  ;;  %v1270_v16 = vrot.slane %v1268_v62, 5 }
  0x11   :  { %v1276_v17 = vrot.slane %v1274_v63, 5  ;;  %v2950_v19 = vld [vmem:[%s3725_s1 + $0x34] sm:$0xf]  ;;  %v1235_v20 = vsel %vm2932_vm4, %v1230_v2, %v1234_v45  ;;  %v1257_v21 = vor.u32 %v1256_v9, %v1253_v3  ;;  %v1651_v25 = vsel %vm200_vm0, %v2244_v0, 0  ;;  %v2960_v28 = vld [vmem:[%s3727_s2 + $0x20] sm:$0xf] }
  0x12   :  { %3750 = vst [vmem:[#allocation5_spill] sm:$0xff] %v2950_v19  ;;  %v2150_v26 = vcombine.low %v2945_v13, %v2950_v19  ;;  %v87_v29 = vld [vmem:[%s3727_s2 + $0x24] sm:$0x1]  ;;  %v1249_v31 = vsel %vm2932_vm4, %v1244_v14, %v1248_v49  ;;  %v1271_v33 = vor.u32 %v1270_v16, %v1267_v15  ;;  %v2970_v34 = vld [vmem:[%s3727_s2 + $0x28] sm:$0xf]  ;;  %v1279_v36 = vshrl.u32 %v2960_v28, 16 }
  0x13   :  { %v89_v35 = vld [vmem:[%s3727_s2 + $0x2c] sm:$0x1]  ;;  %v1282_v37 = vshll.u32 %v2960_v28, 16  ;;  %v2228_v38 = vcombine.low %v1235_v20, %v1249_v31  ;;  %v1258_v39 = vrot.slane %v1257_v21, 4  ;;  %v1288_v43 = vshll.u32 %v87_v29, 16 }
  0x14   :  { %v1293_v44 = vshrl.u32 %v2970_v34, 16  ;;  %v2981_v45 = vld [vmem:[%s3725_s1 + $0x38] sm:$0xf]  ;;  %v1272_v46 = vrot.slane %v1271_v33, 4  ;;  %v1281_v48 = vrot.slane %v1279_v36, 4  ;;  %v1296_v51 = vshll.u32 %v2970_v34, 16 }
  0x15   :  { %3751 = vst [vmem:[#allocation6_spill] sm:$0xff] %v2981_v45  ;;  %v1284_v49 = vrot.slane %v1282_v37, 5  ;;  %v2988_v54 = vld [vmem:[%s3725_s1 + $0x3c] sm:$0xf]  ;;  %2469 = vmatprep.mubr.msk.bf16.mxu0 %vm175_vm1, %v2228_v38  ;;  %v1263_v55 = vsel %vm2932_vm4, %v1258_v39, %v1262_v11  ;;  %v1290_v56 = vrot.slane %v1288_v43, 5 }
  0x16   :  { %2388 = vmatmul.mubr.msk.bf16.gmra.mrb[8].mxu1 %vm175_vm1, %v2149_v50  ;;  %3752 = vst [vmem:[#allocation7_spill] sm:$0xff] %v2988_v54  ;;  %v1295_v57 = vrot.slane %v1293_v44, 4  ;;  %v1302_v50 = vshll.u32 %v89_v35, 16  ;;  %v2997_v58 = vld [vmem:[%s3727_s2 + $0x30] sm:$0xf]  ;;  %v1277_v60 = vsel %vm2932_vm4, %v1272_v46, %v1276_v17  ;;  %v1298_v62 = vrot.slane %v1296_v51, 5 }
  0x17   :  { %2391 = vmatprep.mubr.msk.bf16.mxu1 %vm175_vm1, %v2150_v26  ;;  %3753 = vst [vmem:[#allocation8_spill] sm:$0xff] %v2997_v58  ;;  %v1285_v61 = vor.u32 %v1284_v49, %v1281_v48  ;;  %v2151_v63 = vcombine.low %v2981_v45, %v2988_v54  ;;  %v91_v0 = vld [vmem:[%s3727_s2 + $0x34] sm:$0x1]  ;;  %v3009_v2 = vld [vmem:[%s3727_s2 + $0x38] sm:$0xf]  ;;  %v2229_v3 = vcombine.low %v1263_v55, %v1277_v60  ;;  %v1307_v14 = vshrl.u32 %v2997_v58, 16 }
  0x18   :  { %3754 = vst [vmem:[#allocation9_spill] sm:$0xff] %v3009_v2  ;;  %v1304_v9 = vrot.slane %v1302_v50, 5  ;;  %v93_v11 = vld [vmem:[%s3727_s2 + $0x3c] sm:$0x1]  ;;  %v1310_v15 = vshll.u32 %v2997_v58, 16  ;;  %v1299_v17 = vor.u32 %v1298_v62, %v1295_v57  ;;  %v1316_v20 = vshll.u32 %v91_v0, 16 }
  0x19   :  { %v1286_v16 = vrot.slane %v1285_v61, 4  ;;  %v1321_v21 = vshrl.u32 %v3009_v2, 16  ;;  %v3020_v26 = vld [vmem:[%s3728_s0] sm:$0xf]  ;;  %2470 = vmatmul.mubr.msk.bf16.vlgmr.msra.gmra.mrb[0].mxu0 %vm175_vm1, %v2229_v3  ;;  %v1309_v29 = vrot.slane %v1307_v14, 4  ;;  %v1324_v33 = vshll.u32 %v3009_v2, 16 }
  0x1a   :  { %v1312_v31 = vrot.slane %v1310_v15, 5  ;;  %v1330_v35 = vshll.u32 %v93_v11, 16  ;;  %v3027_v36 = vld [vmem:[%s3728_s0 + $0x8] sm:$0xf]  ;;  %2486 = vmatpush3.bf16.msra.mxu0 %v1651_v25  ;;  %v1300_v38 = vrot.slane %v1299_v17, 4  ;;  %v1318_v44 = vrot.slane %v1316_v20, 5 }
  0x1b   :  { %v1291_v37 = vsel %vm2932_vm4, %v1286_v16, %v1290_v56  ;;  %v1323_v39 = vrot.slane %v1321_v21, 4  ;;  %v1326_v46 = vrot.slane %v1324_v33, 5  ;;  %v2160_v48 = vcombine.low %v3020_v26, %v3027_v36  ;;  %v3036_v49 = vld [vmem:[%s3727_s2 + $0x40] sm:$0xf]  ;;  %v95_v25 = vld [vmem:[%s3727_s2 + $0x44] sm:$0x1] }
  0x1c   :  { %v1313_v43 = vor.u32 %v1312_v31, %v1309_v29  ;;  %3755 = vst [vmem:[#allocation10_spill] sm:$0xff] %v3036_v49  ;;  %v1305_v51 = vsel %vm2932_vm4, %v1300_v38, %v1304_v9  ;;  %v3047_v55 = vld [vmem:[%s3727_s2 + $0x48] sm:$0xf]  ;;  %v1332_v60 = vrot.slane %v1330_v35, 5  ;;  %v97_v61 = vld [vmem:[%s3727_s2 + $0x4c] sm:$0x1] }
  0x1d   :  { %3756 = vst [vmem:[#allocation11_spill] sm:$0xff] %v3047_v55  ;;  %v2230_v56 = vcombine.low %v1291_v37, %v1305_v51  ;;  %v1327_v50 = vor.u32 %v1326_v46, %v1323_v39  ;;  %v3056_v62 = vld [vmem:[%s3728_s0 + $0x10] sm:$0xf]  ;;  %v1338_v0 = vshll.u32 %v3036_v49, 16  ;;  %v3063_v3 = vld [vmem:[%s3728_s0 + $0x18] sm:$0xf] }
  0x1e   :  { %2392 = vmatmul.mubr.msk.bf16.gmra.mrb[12].mxu1 %vm175_vm1, %v2151_v63  ;;  %v1314_v57 = vrot.slane %v1313_v43, 4  ;;  %v1335_v63 = vshrl.u32 %v3036_v49, 16  ;;  %v2176_v9 = vld [vmem:[%s3724_s6 + $0x4] sm:$0x3]  ;;  %v1344_v15 = vshll.u32 %v95_v25, 16  ;;  %v1349_v16 = vshrl.u32 %v3047_v55, 16 }
  0x1f   :  { %2397 = vmatprep.mubr.msk.bf16.mxu1 %vm175_vm1, %v2160_v48  ;;  %2473 = vmatprep.mubr.msk.bf16.mxu0 %vm175_vm1, %v2230_v56  ;;  %v1328_v14 = vrot.slane %v1327_v50, 4  ;;  %v1340_v20 = vrot.slane %v1338_v0, 5  ;;  %v1352_v21 = vshll.u32 %v3047_v55, 16  ;;  %v1358_v29 = vshll.u32 %v97_v61, 16  ;;  %v3081_v37 = vld [vmem:[%s3727_s2 + $0x50] sm:$0xf] }
  0x20   :  { %v1319_v11 = vsel %vm2932_vm4, %v1314_v57, %v1318_v44  ;;  %2671 = vmatprep.subr.msk.bf16.mxu1 %vm200_vm0, %v2176_v9  ;;  %v1337_v17 = vrot.slane %v1335_v63, 4  ;;  %v1351_v33 = vrot.slane %v1349_v16, 4  ;;  %v2161_v35 = vcombine.low %v3056_v62, %v3063_v3  ;;  %v99_v38 = vld [vmem:[%s3727_s2 + $0x54] sm:$0x1]  ;;  %v3089_v48 = vld [vmem:[%s3727_s2 + $0x58] sm:$0xf] }
  0x21   :  { %v1333_v31 = vsel %vm2932_vm4, %v1328_v14, %v1332_v60  ;;  %v1346_v44 = vrot.slane %v1344_v15, 5  ;;  %v1354_v46 = vrot.slane %v1352_v21, 5  ;;  %v101_v51 = vld [vmem:[%s3727_s2 + $0x5c] sm:$0x1]  ;;  %v469_v25 = vshrl.u32 %v3020_v26, 16 }
  0x22   :  { %v2231_v39 = vcombine.low %v1319_v11, %v1333_v31  ;;  %v1341_v43 = vor.u32 %v1340_v20, %v1337_v17  ;;  %v472_v56 = vshll.u32 %v3020_v26, 16  ;;  %v1360_v50 = vrot.slane %v1358_v29, 5  ;;  %v3104_v11 = vld [vmem:[%s3728_s0 + $0x20] sm:$0xf]  ;;  %v3111_v17 = vld [vmem:[%s3728_s0 + $0x28] sm:$0xf] }
  0x23   :  { %v1355_v61 = vor.u32 %v1354_v46, %v1351_v33  ;;  %v1363_v63 = vshrl.u32 %v3081_v37, 16  ;;  %v1366_v0 = vshll.u32 %v3081_v37, 16  ;;  %v1372_v14 = vshll.u32 %v99_v38, 16  ;;  %v107_v12 = vld [vmem:[%s3727_s2 + $0x74] sm:$0x1] }
  0x24   :  { %2474 = vmatmul.mubr.msk.bf16.gmra.mrb[4].mxu0 %vm175_vm1, %v2231_v39  ;;  %v1342_v60 = vrot.slane %v1341_v43, 4  ;;  %v1377_v26 = vshrl.u32 %v3089_v48, 16  ;;  %v1380_v15 = vshll.u32 %v3089_v48, 16  ;;  %v1386_v16 = vshll.u32 %v101_v51, 16  ;;  %v3175_v42 = vld [vmem:[%s3727_s2 + $0x78] sm:$0xf] }
  0x25   :  { %v1356_v21 = vrot.slane %v1355_v61, 4  ;;  %v1365_v29 = vrot.slane %v1363_v63, 4  ;;  %v1368_v31 = vrot.slane %v1366_v0, 5  ;;  %v743_v51 = vsel %vm200_vm0, %v2176_v9, 0  ;;  %v3134_v9 = vld [vmem:[%s3727_s2 + $0x68] sm:$0xf] }
  0x26   :  { %2398 = vmatmul.mubr.msk.bf16.vlgmr.msra.gmra.mrb[0].mxu1 %vm175_vm1, %v2161_v35  ;;  %v1347_v20 = vsel %vm2932_vm4, %v1342_v60, %v1346_v44  ;;  %v1374_v35 = vrot.slane %v1372_v14, 5  ;;  %v1379_v38 = vrot.slane %v1377_v26, 4  ;;  %v1382_v39 = vrot.slane %v1380_v15, 5  ;;  %v3124_v44 = vld [vmem:[%s3727_s2 + $0x60] sm:$0xf] }
  0x27   :  { %v1361_v43 = vsel %vm2932_vm4, %v1356_v21, %v1360_v50  ;;  %v1369_v46 = vor.u32 %v1368_v31, %v1365_v29  ;;  %v2162_v53 = vcombine.low %v3104_v11, %v3111_v17  ;;  %v103_v60 = vld [vmem:[%s3727_s2 + $0x64] sm:$0x1]  ;;  %v3129_v61 = vrot.slane %v469_v25, 4  ;;  %2414 = vmatpush3.bf16.msra.mxu1 %v743_v51  ;;  %v105_v14 = vld [vmem:[%s3727_s2 + $0x6c] sm:$0x1] }
  0x28   :  { %v2232_v63 = vcombine.low %v1347_v20, %v1361_v43  ;;  %v1383_v0 = vor.u32 %v1382_v39, %v1379_v38  ;;  %v1388_v50 = vrot.slane %v1386_v16, 5  ;;  %v3139_v26 = vrot.slane %v472_v56, 5  ;;  %v3150_v56 = vld [vmem:[%s3728_s0 + $0x30] sm:$0xf]  ;;  %v43_v40 = vld [vmem:[%s3728_s0 + $0x34] sm:$0x1] }
  0x29   :  { %v1370_v21 = vrot.slane %v1369_v46, 4  ;;  %2401 = vmatprep.mubr.msk.bf16.mxu1 %vm175_vm1, %v2162_v53  ;;  %v1391_v20 = vshrl.u32 %v3124_v44, 16  ;;  %v1394_v29 = vshll.u32 %v3124_v44, 16  ;;  %v1400_v31 = vshll.u32 %v103_v60, 16  ;;  %v3159_v46 = vld [vmem:[%s3728_s0 + $0x38] sm:$0xf] }
  0x2a   :  { %2477 = vmatprep.mubr.msk.bf16.mxu0 %vm175_vm1, %v2232_v63  ;;  %v1384_v16 = vrot.slane %v1383_v0, 4  ;;  %v1405_v39 = vshrl.u32 %v3134_v9, 16  ;;  %v1408_v53 = vshll.u32 %v3134_v9, 16  ;;  %v1414_v43 = vshll.u32 %v105_v14, 16 }
  0x2b   :  { %v1375_v38 = vsel %vm2932_vm4, %v1370_v21, %v1374_v35  ;;  %v1393_v63 = vrot.slane %v1391_v20, 4  ;;  %v1396_v0 = vrot.slane %v1394_v29, 5  ;;  %v3167_v35 = vld [vmem:[%s3727_s2 + $0x70] sm:$0xf]  ;;  %v1402_v20 = vrot.slane %v1400_v31, 5 }
  0x2c   :  { %v1389_v60 = vsel %vm2932_vm4, %v1384_v16, %v1388_v50  ;;  %v1407_v24 = vrot.slane %v1405_v39, 4  ;;  %v1410_v14 = vrot.slane %v1408_v53, 5  ;;  %v2163_v29 = vcombine.low %v3150_v56, %v3159_v46  ;;  %v3186_v39 = vld [vmem:[%s3724_s6 + $0xe] sm:$0x3] }
  0x2d   :  { %v2233_v21 = vcombine.low %v1375_v38, %v1389_v60  ;;  %v1397_v16 = vor.u32 %v1396_v0, %v1393_v63  ;;  %v109_v38 = vld [vmem:[%s3727_s2 + $0x7c] sm:$0x1]  ;;  %v1416_v10 = vrot.slane %v1414_v43, 5  ;;  %v1419_v31 = vshrl.u32 %v3167_v35, 16  ;;  %v46_v63 = vld [vmem:[%s3728_s0 + $0x40] sm:$0xf]  ;;  %2677 = vmatprep.subr.msk.bf16.mxu0 %vm200_vm0, %v3186_v39 }
  0x2e   :  { %v1411_v60 = vor.u32 %v1410_v14, %v1407_v24  ;;  %2402 = vmatmul.mubr.msk.bf16.gmra.mrb[4].mxu1 %vm175_vm1, %v2163_v29  ;;  %v1422_v50 = vshll.u32 %v3167_v35, 16  ;;  %v1428_v51 = vshll.u32 %v107_v12, 16  ;;  %v3202_v24 = vld [vmem:[%s3728_s0 + $0x48] sm:$0xf]  ;;  %v1436_v53 = vshll.u32 %v3175_v42, 16 }
  0x2f   :  { %2478 = vmatmul.mubr.msk.bf16.gmra.mrb[8].mxu0 %vm175_vm1, %v2233_v21  ;;  %v1398_v0 = vrot.slane %v1397_v16, 4  ;;  %v1433_v21 = vshrl.u32 %v3175_v42, 16  ;;  %v1421_v14 = vrot.slane %v1419_v31, 4  ;;  %v1442_v25 = vshll.u32 %v109_v38, 16  ;;  %v3220_v38 = vld [vmem:[%s3728_s0 + $0x58] sm:$0xf] }
  0x30   :  { %v1412_v43 = vrot.slane %v1411_v60, 4  ;;  %v1424_v29 = vrot.slane %v1422_v50, 5  ;;  %v1438_v54 = vrot.slane %v1436_v53, 5  ;;  %v2164_v19 = vcombine.low %v46_v63, %v3202_v24  ;;  %v3215_v60 = vld [vmem:[%s3728_s0 + $0x50] sm:$0xf] }
  0x31   :  { %v1403_v16 = vsel %vm2932_vm4, %v1398_v0, %v1402_v20  ;;  %v1435_v33 = vrot.slane %v1433_v21, 4  ;;  %v1430_v0 = vrot.slane %v1428_v51, 5  ;;  %v1444_v21 = vrot.slane %v1442_v25, 5  ;;  %v3232_v12 = vld [vmem:[%s3728_s0 + $0x68] sm:$0xf] }
  0x32   :  { %v1417_v57 = vsel %vm2932_vm4, %v1412_v43, %v1416_v10  ;;  %v1425_v31 = vor.u32 %v1424_v29, %v1421_v14  ;;  %v3226_v10 = vld [vmem:[%s3728_s0 + $0x60] sm:$0xf]  ;;  %2405 = vmatprep.mubr.msk.bf16.mxu1 %vm175_vm1, %v2164_v19  ;;  %v581_v43 = vshrl.u32 %v46_v63, 16  ;;  %v2165_v19 = vcombine.low %v3215_v60, %v3220_v38  ;;  %v3259_v25 = vld [vmem:[%s3728_s0 + $0x70] sm:$0xf] }
  0x33   :  { %v2234_v20 = vcombine.low %v1403_v16, %v1417_v57  ;;  %v1439_v53 = vor.u32 %v1438_v54, %v1435_v33  ;;  %v3237_v57 = vld [vmem:[%s3724_s6 + $0x6] sm:$0x3]  ;;  %v584_v33 = vshll.u32 %v46_v63, 16  ;;  %v1805_v15 = vsel %vm200_vm0, %v3186_v39, 0  ;;  %v3297_v50 = vld [vmem:[%s3729_s4] sm:$0xf] }
  0x34   :  { %v1426_v54 = vrot.slane %v1425_v31, 4  ;;  %2672 = vmatprep.subr.msk.bf16.mxu1 %vm200_vm0, %v3237_v57  ;;  %v2166_v31 = vcombine.low %v3226_v10, %v3232_v12  ;;  %v3263_v16 = vrot.slane %v581_v43, 4  ;;  %3757 = vst [vmem:[#allocation12_spill] sm:$0xff] %v3297_v50  ;;  %v475_v51 = vor.u32 %v3139_v26, %v3129_v61 }
  0x35   :  { %2481 = vmatprep.mubr.msk.bf16.mxu0 %vm175_vm1, %v2234_v20  ;;  %v1440_v29 = vrot.slane %v1439_v53, 4  ;;  %v3276_v14 = vrot.slane %v584_v33, 5  ;;  %v2247_v41 = vcombine.low %v3111_v17, %v3150_v56  ;;  %v3761_v45 = vshll.u32 %v3056_v62, 16 }
  0x36   :  { %v1431_v20 = vsel %vm2932_vm4, %v1426_v54, %v1430_v0  ;;  %2406 = vmatmul.mubr.msk.bf16.gmra.mrb[8].mxu1 %vm175_vm1, %v2165_v19  ;;  %v2245_v0 = vcombine.low %v3027_v36, %v3056_v62  ;;  %v3271_v54 = vld [vmem:[%s3728_s0 + $0x78] sm:$0xf]  ;;  %v31_v19 = vld [vmem:[%s3728_s0 + $0x4] sm:$0x1]  ;;  %v476_v26 = vrot.slane %v475_v51, 4  ;;  %v3762_v55 = vshrl.u32 %v3063_v3, 16 }
  0x37   :  { %v1445_v53 = vsel %vm2932_vm4, %v1440_v29, %v1444_v21  ;;  %2409 = vmatprep.mubr.msk.bf16.mxu1 %vm175_vm1, %v2166_v31  ;;  %v33_v29 = vld [vmem:[%s3728_s0 + $0xc] sm:$0x1]  ;;  %v2167_v31 = vcombine.low %v3259_v25, %v3271_v54  ;;  %v478_v39 = vshll.u32 %v31_v19, 16  ;;  %v35_v21 = vld [vmem:[%s3728_s0 + $0x14] sm:$0x1]  ;;  %v502_v13 = vrot.slane %v3761_v45, 5 }
  0x38   :  { %v2235_v63 = vcombine.low %v1431_v20, %v1445_v53  ;;  %v3759_v20 = vshll.u32 %v3027_v36, 16  ;;  %v492_v43 = vshll.u32 %v33_v29, 16  ;;  %v3760_v29 = vshrl.u32 %v3056_v62, 16  ;;  %v41_v45 = vld [vmem:[%s3728_s0 + $0x2c] sm:$0x1] }
  0x39   :  { %v480_v19 = vrot.slane %v478_v39, 5  ;;  %v506_v49 = vshll.u32 %v35_v21, 16  ;;  %v513_v61 = vrot.slane %v3762_v55, 4  ;;  %v3763_v51 = vshll.u32 %v3063_v3, 16  ;;  %v3338_v55 = vld [vmem:[%s3724_s6 + $0x10] sm:$0x3] }
  0x3a   :  { %2482 = vmatmul.mubr.msk.bf16.gmra.mrb[12].mxu0 %vm175_vm1, %v2235_v63  ;;  %v3758_v63 = vshrl.u32 %v3027_v36, 16  ;;  %v488_v53 = vrot.slane %v3759_v20, 5  ;;  %v494_v20 = vrot.slane %v492_v43, 5  ;;  %v2248_v43 = vcombine.low %v3159_v46, %v3297_v50 }
  0x3b   :  { %2487 = vmatprep.mubr.msk.bf16.mxu0 %vm175_vm1, %v2245_v0  ;;  %v37_v0 = vld [vmem:[%s3728_s0 + $0x1c] sm:$0x1]  ;;  %v516_v58 = vrot.slane %v3763_v51, 5  ;;  %v2249_v21 = vcombine.low %v3202_v24, %v3215_v60  ;;  %v3765_v50 = vshll.u32 %v3104_v11, 16 }
  0x3c   :  { %v485_v33 = vrot.slane %v3758_v63, 4  ;;  %v499_v63 = vrot.slane %v3760_v29, 4  ;;  %v520_v62 = vshll.u32 %v37_v0, 16  ;;  %v508_v29 = vrot.slane %v506_v49, 5 }
  0x3d   :  { %v517_v51 = vor.u32 %v516_v58, %v513_v61  ;;  %v530_v2 = vrot.slane %v3765_v50, 5 }
  0x3e   :  { %v489_v36 = vor.u32 %v488_v53, %v485_v33  ;;  %2410 = vmatmul.mubr.msk.bf16.gmra.mrb[12].mxu1 %vm175_vm1, %v2167_v31  ;;  %v39_v33 = vld [vmem:[%s3728_s0 + $0x24] sm:$0x1]  ;;  %v481_v53 = vsel %vm2932_vm4, %v476_v26, %v480_v19  ;;  %v503_v39 = vor.u32 %v502_v13, %v499_v63  ;;  %v522_v0 = vrot.slane %v520_v62, 5  ;;  %v45_v63 = vld [vmem:[%s3728_s0 + $0x3c] sm:$0x1] }
  0x3f   :  { %v3764_v19 = vshrl.u32 %v3104_v11, 16  ;;  %v3766_v13 = vcombine.low %v3063_v3, %v3104_v11  ;;  %v518_v61 = vrot.slane %v517_v51, 4  ;;  %v3768_v3 = vshll.u32 %v3111_v17, 16 }
  0x40   :  { %v490_v31 = vrot.slane %v489_v36, 4  ;;  %v504_v49 = vrot.slane %v503_v39, 4 }
  0x41   :  { %v527_v36 = vrot.slane %v3764_v19, 4  ;;  %v544_v11 = vrot.slane %v3768_v3, 5  ;;  %v548_v19 = vshll.u32 %v41_v45, 16 }
  0x42   :  { %v3344_v26 = vsel %vm2932_vm4, %v490_v31, %v494_v20  ;;  %2488 = vmatmul.mubr.msk.bf16.vlgmr.msra.gmra.mrb[0].mxu0 %vm175_vm1, %v3766_v13  ;;  %v534_v20 = vshll.u32 %v39_v33, 16  ;;  %v3767_v31 = vshrl.u32 %v3111_v17, 16  ;;  %v3369_v33 = vsel %vm2932_vm4, %v504_v49, %v508_v29 }
  0x43   :  { %v2177_v58 = vcombine.low %v481_v53, %v3344_v26  ;;  %2504 = vmatpush3.bf16.msra.mxu0 %v1805_v15  ;;  %2491 = vmatprep.mubr.msk.bf16.mxu0 %vm175_vm1, %v2247_v41  ;;  %v531_v50 = vor.u32 %v530_v2, %v527_v36  ;;  %v3373_v53 = vsel %vm2932_vm4, %v518_v61, %v522_v0  ;;  %v925_v41 = vsel %vm200_vm0, %v3237_v57, 0 }
  0x44   :  { %v541_v62 = vrot.slane %v3767_v31, 4  ;;  %v536_v2 = vrot.slane %v534_v20, 5  ;;  %2678 = vmatprep.subr.msk.bf16.mxu0 %vm200_vm0, %v3338_v55  ;;  %v2178_v17 = vcombine.low %v3369_v33, %v3373_v53  ;;  %v550_v39 = vrot.slane %v548_v19, 5 }
  0x45   :  { %2415 = vmatprep.mubr.msk.bf16.mxu1 %vm175_vm1, %v2177_v58  ;;  %v532_v15 = vrot.slane %v531_v50, 4  ;;  %v3769_v29 = vshrl.u32 %v3150_v56, 16  ;;  %v3770_v36 = vshll.u32 %v3150_v56, 16  ;;  %v562_v13 = vshll.u32 %v43_v40, 16 }
  0x46   :  { %v545_v45 = vor.u32 %v544_v11, %v541_v62  ;;  %v3771_v58 = vshrl.u32 %v3159_v46, 16  ;;  %2416 = vmatmul.mubr.msk.bf16.vlgmr.msra.gmra.mrb[0].mxu1 %vm175_vm1, %v2178_v17  ;;  %v3772_v20 = vshll.u32 %v3159_v46, 16  ;;  %v576_v31 = vshll.u32 %v45_v63, 16  ;;  %v47_v11 = vld [vmem:[%s3728_s0 + $0x44] sm:$0x1] }
  0x47   :  { %v555_v51 = vrot.slane %v3769_v29, 4  ;;  %v558_v0 = vrot.slane %v3770_v36, 5  ;;  %v3390_v49 = vsel %vm2932_vm4, %v532_v15, %v536_v2  ;;  %v668_v62 = vshll.u32 %v3259_v25, 16  ;;  %2432 = vmatpush3.bf16.msra.mxu1 %v925_v41  ;;  %v3407_v63 = vld [vmem:[%s3729_s4 + $0x8] sm:$0xf] }
  0x48   :  { %v569_v57 = vrot.slane %v3771_v58, 4  ;;  %v546_v61 = vrot.slane %v545_v45, 4  ;;  %v572_v50 = vrot.slane %v3772_v20, 5  ;;  %v679_v56 = vshrl.u32 %v3271_v54, 16  ;;  %2674 = vmatprep.subr.msk.bf16.mxu1 %vm200_vm0, %v2774_v1 }
  0x49   :  { %v559_v40 = vor.u32 %v558_v0, %v555_v51  ;;  %v564_v3 = vrot.slane %v562_v13, 5  ;;  %v682_v19 = vshll.u32 %v3271_v54, 16  ;;  %v578_v17 = vrot.slane %v576_v31, 5  ;;  %v51_v13 = vld [vmem:[%s3728_s0 + $0x54] sm:$0x1] }
  0x4a   :  { %v3402_v2 = vsel %vm2932_vm4, %v546_v61, %v550_v39  ;;  %v573_v46 = vor.u32 %v572_v50, %v569_v57  ;;  %2492 = vmatmul.mubr.msk.bf16.gmra.mrb[4].mxu0 %vm175_vm1, %v2248_v43  ;;  %v2250_v41 = vcombine.low %v3220_v38, %v3226_v10  ;;  %v49_v39 = vld [vmem:[%s3728_s0 + $0x4c] sm:$0x1]  ;;  %v587_v29 = vor.u32 %v3276_v14, %v3263_v16  ;;  %v53_v31 = vld [vmem:[%s3728_s0 + $0x5c] sm:$0x1] }
  0x4b   :  { %v2179_v15 = vcombine.low %v3390_v49, %v3402_v2  ;;  %v560_v45 = vrot.slane %v559_v40, 4  ;;  %2495 = vmatprep.mubr.msk.bf16.mxu0 %vm175_vm1, %v2249_v21  ;;  %v2251_v1 = vcombine.low %v3232_v12, %v3259_v25  ;;  %v590_v51 = vshll.u32 %v47_v11, 16 }
  0x4c   :  { %v574_v43 = vrot.slane %v573_v46, 4  ;;  %v3773_v36 = vshrl.u32 %v3202_v24, 16  ;;  %v2252_v14 = vcombine.low %v3271_v54, %v3407_v63  ;;  %v588_v16 = vrot.slane %v587_v29, 4 }
  0x4d   :  { %2419 = vmatprep.mubr.msk.bf16.mxu1 %vm175_vm1, %v2179_v15  ;;  %v3432_v58 = vsel %vm2932_vm4, %v560_v45, %v564_v3  ;;  %v3774_v21 = vshll.u32 %v3202_v24, 16  ;;  %v592_v20 = vrot.slane %v590_v51, 5  ;;  %v604_v50 = vshll.u32 %v49_v39, 16 }
  0x4e   :  { %v597_v0 = vrot.slane %v3773_v36, 4  ;;  %v3440_v61 = vsel %vm2932_vm4, %v574_v43, %v578_v17  ;;  %v3775_v40 = vshrl.u32 %v3215_v60, 16  ;;  %v3776_v24 = vshll.u32 %v3215_v60, 16 }
  0x4f   :  { %v600_v57 = vrot.slane %v3774_v21, 5  ;;  %v2180_v11 = vcombine.low %v3432_v58, %v3440_v61  ;;  %v618_v45 = vshll.u32 %v51_v13, 16  ;;  %v593_v17 = vsel %vm2932_vm4, %v588_v16, %v592_v20  ;;  %v55_v21 = vld [vmem:[%s3728_s0 + $0x64] sm:$0x1]  ;;  %v57_v20 = vld [vmem:[%s3728_s0 + $0x6c] sm:$0x1] }
  0x50   :  { %v611_v3 = vrot.slane %v3775_v40, 4  ;;  %v614_v15 = vrot.slane %v3776_v24, 5  ;;  %v606_v29 = vrot.slane %v604_v50, 5  ;;  %v3777_v39 = vshrl.u32 %v3220_v38, 16 }
  0x51   :  { %v601_v46 = vor.u32 %v600_v57, %v597_v0  ;;  %v3778_v51 = vshll.u32 %v3220_v38, 16  ;;  %2420 = vmatmul.mubr.msk.bf16.gmra.mrb[4].mxu1 %vm175_vm1, %v2180_v11  ;;  %v620_v57 = vrot.slane %v618_v45, 5  ;;  %v632_v13 = vshll.u32 %v53_v31, 16 }
  0x52   :  { %v625_v43 = vrot.slane %v3777_v39, 4  ;;  %v615_v60 = vor.u32 %v614_v15, %v611_v3  ;;  %v1935_v40 = vshrl.u32 %v3407_v63, 16  ;;  %v3779_v38 = vshrl.u32 %v3226_v10, 16  ;;  %2496 = vmatmul.mubr.msk.bf16.gmra.mrb[8].mxu0 %vm175_vm1, %v2250_v41 }
  0x53   :  { %v628_v36 = vrot.slane %v3778_v51, 5  ;;  %v602_v0 = vrot.slane %v601_v46, 4  ;;  %v3780_v24 = vshll.u32 %v3226_v10, 16  ;;  %v634_v11 = vrot.slane %v632_v13, 5  ;;  %2499 = vmatprep.mubr.msk.bf16.mxu0 %vm175_vm1, %v2251_v1  ;;  %v59_v10 = vld [vmem:[%s3728_s0 + $0x74] sm:$0x1] }
  0x54   :  { %v639_v50 = vrot.slane %v3779_v38, 4  ;;  %v616_v31 = vrot.slane %v615_v60, 4  ;;  %v646_v46 = vshll.u32 %v55_v21, 16  ;;  %v3781_v51 = vshrl.u32 %v3232_v12, 16  ;;  %v61_v13 = vld [vmem:[%s3728_s0 + $0x7c] sm:$0x1] }
  0x55   :  { %v629_v16 = vor.u32 %v628_v36, %v625_v43  ;;  %v642_v39 = vrot.slane %v3780_v24, 5  ;;  %v3472_v3 = vsel %vm2932_vm4, %v602_v0, %v606_v29  ;;  %v3782_v21 = vshll.u32 %v3232_v12, 16 }
  0x56   :  { %v2181_v15 = vcombine.low %v593_v17, %v3472_v3  ;;  %v653_v36 = vrot.slane %v3781_v51, 4  ;;  %v3483_v41 = vsel %vm2932_vm4, %v616_v31, %v620_v57  ;;  %v648_v29 = vrot.slane %v646_v46, 5 }
  0x57   :  { %v630_v45 = vrot.slane %v629_v16, 4  ;;  %v643_v43 = vor.u32 %v642_v39, %v639_v50  ;;  %v656_v0 = vrot.slane %v3782_v21, 5  ;;  %v660_v1 = vshll.u32 %v57_v20, 16 }
  0x58   :  { %2423 = vmatprep.mubr.msk.bf16.mxu1 %vm175_vm1, %v2181_v15  ;;  %v3783_v16 = vshrl.u32 %v3259_v25, 16  ;;  %v670_v38 = vrot.slane %v668_v62, 5  ;;  %v674_v24 = vshll.u32 %v59_v10, 16  ;;  %v1938_v39 = vshll.u32 %v3407_v63, 16 }
  0x59   :  { %v3490_v17 = vsel %vm2932_vm4, %v630_v45, %v634_v11  ;;  %v644_v60 = vrot.slane %v643_v43, 4  ;;  %v657_v20 = vor.u32 %v656_v0, %v653_v36  ;;  %v662_v50 = vrot.slane %v660_v1, 5 }
  0x5a   :  { %v667_v57 = vrot.slane %v3783_v16, 4  ;;  %v2182_v12 = vcombine.low %v3483_v41, %v3490_v17  ;;  %v681_v11 = vrot.slane %v679_v56, 4  ;;  %v684_v46 = vrot.slane %v682_v19, 5  ;;  %2500 = vmatmul.mubr.msk.bf16.gmra.mrb[12].mxu0 %vm175_vm1, %v2252_v14 }
  0x5b   :  { %v3509_v25 = vsel %vm2932_vm4, %v644_v60, %v648_v29  ;;  %v658_v62 = vrot.slane %v657_v20, 4  ;;  %v676_v15 = vrot.slane %v674_v24, 5  ;;  %v688_v45 = vshll.u32 %v61_v13, 16 }
  0x5c   :  { %v671_v31 = vor.u32 %v670_v38, %v667_v57  ;;  %2424 = vmatmul.mubr.msk.bf16.gmra.mrb[8].mxu1 %vm175_vm1, %v2182_v12  ;;  %v685_v51 = vor.u32 %v684_v46, %v681_v11  ;;  %v1937_v56 = vrot.slane %v1935_v40, 4  ;;  %v1940_v10 = vrot.slane %v1938_v39, 5  ;;  %v129_v40 = vld [vmem:[%s3729_s4 + $0xc] sm:$0x1]  ;;  %v131_v11 = vld [vmem:[%s3730_s5 + $0x4] sm:$0xf] }
  0x5d   :  { %v3517_v19 = vsel %vm2932_vm4, %v658_v62, %v662_v50  ;;  %v690_v36 = vrot.slane %v688_v45, 5  ;;  %v3784_v29 = vcombine.low %v2790_v5, %v2795_v6  ;;  %v2199_v14 = vcombine.low %v3081_v37, %v3089_v48  ;;  %v3792_v38 = vld [vmem:[#allocation11_spill] sm:$0xff]  ;;  %v3796_v50 = vld [vmem:[#allocation6_spill] sm:$0xff] }
  0x5e   :  { %v672_v43 = vrot.slane %v671_v31, 4  ;;  %v2183_v21 = vcombine.low %v3509_v25, %v3517_v19  ;;  %v686_v63 = vrot.slane %v685_v51, 4  ;;  %v2200_v6 = vcombine.low %v3124_v44, %v3134_v9  ;;  %v130_v9 = vld [vmem:[%s3730_s5] sm:$0xf]  ;;  %v3795_v12 = vld [vmem:[#allocation3_spill] sm:$0xff] }
  0x5f   :  { %2505 = vmatprep.mubr.msk.bf16.mxu0 %vm175_vm1, %v3784_v29  ;;  %v2201_v0 = vcombine.low %v3167_v35, %v3175_v42  ;;  %v1941_v60 = vor.u32 %v1940_v10, %v1937_v56  ;;  %v1944_v13 = vshll.u32 %v129_v40, 16  ;;  %v1985_v37 = vsel %vm200_vm0, %v3338_v55, 0  ;;  %v3799_v46 = vld [vmem:[#allocation7_spill] sm:$0xff]  ;;  %v127_v51 = vld [vmem:[%s3729_s4 + $0x4] sm:$0x1] }
  0x60   :  { %v3527_v54 = vsel %vm2932_vm4, %v672_v43, %v676_v15  ;;  %2427 = vmatprep.mubr.msk.bf16.mxu1 %vm175_vm1, %v2183_v21  ;;  %v691_v5 = vsel %vm2932_vm4, %v686_v63, %v690_v36  ;;  %v3785_v48 = vcombine.low %v2876_v30, %v2884_v32  ;;  %v3786_v44 = vcombine.low %v2801_v7, %v2806_v8  ;;  %v2719_v10 = vld [vmem:[%s3726_s3 + $0x20] sm:$0xff]  }
  0x61   :  { %v2184_v1 = vcombine.low %v3527_v54, %v691_v5  ;;  %v1942_v16 = vrot.slane %v1941_v60, 4  ;;  %v1946_v57 = vrot.slane %v1944_v13, 5  ;;  %v3787_v42 = vcombine.low %v2835_v18, %v2848_v22  ;;  %v3788_v18 = vld [vmem:[#allocation2_spill] sm:$0xff] }
  0x62   :  { %2506 = vmatmul.mubr.msk.bf16.vlgmr.msra.gmra.mrb[0].mxu0 %vm175_vm1, %v3786_v44  ;;  %v2195_v32 = vcombine.low %v2908_v47, %v2919_v52  ;;  %v2196_v7 = vcombine.low %v2960_v28, %v2970_v34  ;;  %v2265_v8 = vcombine.low %v2853_v23, %v130_v9  ;;  %v3789_v22 = vcombine.low %v2868_v27, %v3788_v18  ;;  %v3790_v47 = vld [vmem:[#allocation9_spill] sm:$0xff]  ;;  %v3791_v52 = vld [vmem:[#allocation8_spill] sm:$0xff]  ;;  %v3793_v28 = vld [vmem:[#allocation10_spill] sm:$0xff] }
  0x63   :  { %2522 = vmatpush3.bf16.msra.mxu0 %v1985_v37  ;;  %2509 = vmatprep.mubr.msk.bf16.mxu0 %vm175_vm1, %v3787_v42  ;;  %v1947_v30 = vsel %vm2932_vm4, %v1942_v16, %v1946_v57  ;;  %v2197_v55 = vcombine.low %v3791_v52, %v3790_v47  ;;  %v2198_v34 = vcombine.low %v3793_v28, %v3792_v38  ;;  %v3794_v23 = vld [vmem:[#allocation4_spill] sm:$0xff]  ;;  %v1930_v36 = vshll.u32 %v127_v51, 16 }
  0x64   :  { %2428 = vmatmul.mubr.msk.bf16.gmra.mrb[12].mxu1 %vm175_vm1, %v2184_v1  ;;  %v2286_v35 = vcombine.low %v691_v5, %v1947_v30  ;;  %v2267_v20 = vcombine.low %v3795_v12, %v3794_v23  ;;  %v3798_v27 = vld [vmem:[#allocation12_spill] sm:$0xff]  ;;  %v2269_v62 = vcombine.low %v3799_v46, %v131_v11  ;;  %v2279_v43 = vcombine.low %v3344_v26, %v3369_v33 }
  0x65   :  { %2433 = vmatprep.mubr.msk.bf16.mxu1 %vm175_vm1, %v3785_v48  ;;  %v1921_v39 = vshrl.u32 %v3798_v27, 16  ;;  %v1924_v31 = vshll.u32 %v3798_v27, 16  ;;  %v2280_v26 = vcombine.low %v3373_v53, %v3390_v49  ;;  %v2281_v33 = vcombine.low %v3402_v2, %v3432_v58  ;;  %v2720_v53 = vld [vmem:[%s3726_s3 + $0x28] sm:$0xff]   ;;  %v2721_v49 = vld [vmem:[%s3726_s3 + $0x30] sm:$0xff]  }
  0x66   :  { %v1932_v21 = vrot.slane %v1930_v36, 5  ;;  %v2283_v58 = vcombine.low %v3472_v3, %v3483_v41 }
  0x67   :  { %v1923_v15 = vrot.slane %v1921_v39, 4  ;;  %v1926_v45 = vrot.slane %v1924_v31, 5 }
  0x69   :  { %v1927_v56 = vor.u32 %v1926_v45, %v1923_v15 }
  0x6a   :  { %2510 = vmatmul.mubr.msk.bf16.gmra.mrb[4].mxu0 %vm175_vm1, %v2265_v8 }
  0x6b   :  { %2513 = vmatprep.mubr.msk.bf16.mxu0 %vm175_vm1, %v3789_v22  ;;  %v1928_v29 = vrot.slane %v1927_v56, 4 }
  0x6c   :  { %2434 = vmatmul.mubr.msk.bf16.vlgmr.msra.gmra.mrb[0].mxu1 %vm175_vm1, %v2195_v32 }
  0x6d   :  { %2540 = vmatpush3.bf16.msra.mxu1 %v2785_v4  ;;  %2437 = vmatprep.mubr.msk.bf16.mxu1 %vm175_vm1, %v2196_v7  ;;  %v3797_v4 = vld [vmem:[#allocation5_spill] sm:$0xff]  ;;  %v1933_v63 = vsel %vm2932_vm4, %v1928_v29, %v1932_v21 }
  0x6e   :  { %v2268_v24 = vcombine.low %v3797_v4, %v3796_v50  ;;  %v2282_v2 = vcombine.low %v3440_v61, %v1933_v63  ;;  %v2285_v61 = vcombine.low %v3517_v19, %v3527_v54 }
  0x72   :  { %2514 = vmatmul.mubr.msk.bf16.gmra.mrb[8].mxu0 %vm175_vm1, %v2267_v20 }
  0x73   :  { %2517 = vmatprep.mubr.msk.bf16.mxu0 %vm175_vm1, %v2268_v24 }
  0x74   :  { %2438 = vmatmul.mubr.msk.bf16.gmra.mrb[4].mxu1 %vm175_vm1, %v2197_v55 }
  0x75   :  { %2441 = vmatprep.mubr.msk.bf16.mxu1 %vm175_vm1, %v2198_v34 }
  0x7a   :  { %2518 = vmatmul.mubr.msk.bf16.gmra.mrb[12].mxu0 %vm175_vm1, %v2269_v62 }
  0x7b   :  { %2523 = vmatprep.mubr.msk.bf16.mxu0 %vm175_vm1, %v2279_v43 }
  0x7c   :  { %2442 = vmatmul.mubr.msk.bf16.gmra.mrb[8].mxu1 %vm175_vm1, %v2199_v14  ;;  %v2284_v14 = vcombine.low %v3490_v17, %v3509_v25  ;;  %v3642_v25 = vld [vmem:[%s3731_s7] ss:$0 sm:$0xff] }
  0x7d   :  { %2445 = vmatprep.mubr.msk.bf16.mxu1 %vm175_vm1, %v2200_v6 }
  0x82   :  { %2524 = vmatmul.mubr.msk.bf16.vlgmr.msra.gmra.mrb[0].mxu0 %vm175_vm1, %v2280_v26 }
  0x83   :  { %2527 = vmatprep.mubr.msk.bf16.mxu0 %vm175_vm1, %v2281_v33 }
  0x84   :  { %2446 = vmatmul.mubr.msk.bf16.gmra.mrb[12].mxu1 %vm175_vm1, %v2201_v0 }
  0x85   :  { %2459 = vmatprep.mubr.msk.bf16.mxu1 %vm175_vm1, %v2719_v10 }
  0x8a   :  { %2528 = vmatmul.mubr.msk.bf16.gmra.mrb[4].mxu0 %vm175_vm1, %v2282_v2 }
  0x8b   :  { %2531 = vmatprep.mubr.msk.bf16.mxu0 %vm175_vm1, %v2283_v58 }
  0x8c   :  { %2460 = vmatmul.mubr.msk.bf16.vlgmr.msra.gmra.mrb[8].mxu1 %vm175_vm1, %v2720_v53 }
  0x8d   :  { %2463 = vmatprep.mubr.msk.bf16.mxu1 %vm175_vm1, %v2721_v49 }
  0x92   :  { %2532 = vmatmul.mubr.msk.bf16.gmra.mrb[8].mxu0 %vm175_vm1, %v2284_v14 }
  0x93   :  { %2535 = vmatprep.mubr.msk.bf16.mxu0 %vm175_vm1, %v2285_v61 }
  0x94   :  { %2464 = vmatmul.mubr.msk.bf16.gmra.mrb[12].mxu1 %vm175_vm1, %v2722_v59 }
  0x9a   :  { %2536 = vmatmul.mubr.msk.bf16.gmra.mrb[12].mxu0 %vm175_vm1, %v2286_v35 }
 0x13f   :  { %v2435_v3 = vpop.f32.mrb[0].mxu1 }
 0x140   :  { %v961_v41 = vpop.f32.mrb[1].mxu1 }
 0x141   :  { %v2436_v40 = vpop.f32.mrb[2].mxu1 }
 0x142   :  { %v964_v5 = vpop.f32.mrb[3].mxu1 }
 0x147   :  { %v2439_v6 = vpop.f32.mrb[4].mxu1 }
 0x148   :  { %v977_v0 = vpop.f32.mrb[5].mxu1 }
 0x149   :  { %v2440_v1 = vpop.f32.mrb[6].mxu1 }
 0x14a   :  { %v980_v60 = vpop.f32.mrb[7].mxu1 }
 0x155   :  { %v2525_v17 = vpop.f32.mrb[0].mxu0 }
 0x156   :  { %v2541_v19 = vadd.f32 %v2525_v17, %v2435_v3  ;;  %v2021_v54 = vpop.f32.mrb[1].mxu0 }
 0x157   :  { %v2542_v13 = vadd.f32 %v2021_v54, %v961_v41  ;;  %v2526_v37 = vpop.f32.mrb[2].mxu0 }
 0x158   :  { %v2109_v48 = vadd.f32 %v2541_v19, %v3642_v25  ;;  %v2543_v16 = vadd.f32 %v2526_v37, %v2436_v40  ;;  %v2024_v57 = vpop.f32.mrb[3].mxu0 }
 0x159   :  { %v2107_v44 = vadd.f32 %v2542_v13, %v3642_v25  ;;  %v2544_v42 = vadd.f32 %v2024_v57, %v964_v5 }
 0x15a   :  { %2125 = vst.msk [vmem:[%s3732_s8 + $0x10] sm:$0xff] %vm175_vm1, %v2109_v48  ;;  %v2110_v9 = vadd.f32 %v2543_v16, %v3642_v25 }
 0x15b   :  { %2123 = vst.msk [vmem:[%s3732_s8] sm:$0xff] %vm175_vm1, %v2107_v44  ;;  %v2108_v30 = vadd.f32 %v2544_v42, %v3642_v25 }
 0x15c   :  { %2126 = vst.msk [vmem:[%s3732_s8 + $0x18] sm:$0xff] %vm175_vm1, %v2110_v9 }
 0x15d   :  { %2124 = vst.msk [vmem:[%s3732_s8 + $0x8] sm:$0xff] %vm175_vm1, %v2108_v30  ;;  %v2529_v7 = vpop.f32.mrb[4].mxu0 }
 0x15e   :  { %v2545_v18 = vadd.f32 %v2529_v7, %v2439_v6  ;;  %v2037_v22 = vpop.f32.mrb[5].mxu0 }
 0x15f   :  { %v2461_v32 = vpop.f32.mrb[8].mxu1  ;;  %v2546_v52 = vadd.f32 %v2037_v22, %v977_v0  ;;  %v2530_v55 = vpop.f32.mrb[6].mxu0 }
 0x160   :  { %v1175_v35 = vpop.f32.mrb[9].mxu1  ;;  %v2113_v38 = vadd.f32 %v2545_v18, %v3642_v25  ;;  %v2547_v28 = vadd.f32 %v2530_v55, %v2440_v1  ;;  %v2040_v34 = vpop.f32.mrb[7].mxu0 }
 0x161   :  { %v2462_v8 = vpop.f32.mrb[10].mxu1  ;;  %v2111_v23 = vadd.f32 %v2546_v52, %v3642_v25  ;;  %v2548_v12 = vadd.f32 %v2040_v34, %v980_v60 }
 0x162   :  { %v1178_v47 = vpop.f32.mrb[11].mxu1  ;;  %2129 = vst.msk [vmem:[%s3732_s8 + $0x30] sm:$0xff] %vm175_vm1, %v2113_v38  ;;  %v2114_v20 = vadd.f32 %v2547_v28, %v3642_v25 }
 0x163   :  { %2127 = vst.msk [vmem:[%s3732_s8 + $0x20] sm:$0xff] %vm175_vm1, %v2111_v23  ;;  %v2112_v50 = vadd.f32 %v2548_v12, %v3642_v25 }
 0x164   :  { %2130 = vst.msk [vmem:[%s3732_s8 + $0x38] sm:$0xff] %vm175_vm1, %v2114_v20 }
 0x165   :  { %2128 = vst.msk [vmem:[%s3732_s8 + $0x28] sm:$0xff] %vm175_vm1, %v2112_v50  ;;  %v2533_v27 = vpop.f32.mrb[8].mxu0 }
 0x166   :  { %v2549_v31 = vadd.f32 %v2533_v27, %v2461_v32  ;;  %v2053_v11 = vpop.f32.mrb[9].mxu0 }
 0x167   :  { %v2465_v4 = vpop.f32.mrb[12].mxu1  ;;  %v2550_v62 = vadd.f32 %v2053_v11, %v1175_v35  ;;  %v2534_v15 = vpop.f32.mrb[10].mxu0 }
 0x168   :  { %v1191_v24 = vpop.f32.mrb[13].mxu1  ;;  %v2117_v45 = vadd.f32 %v2549_v31, %v3642_v25  ;;  %v2551_v43 = vadd.f32 %v2534_v15, %v2462_v8  ;;  %v2056_v51 = vpop.f32.mrb[11].mxu0 }
 0x169   :  { %v2466_v39 = vpop.f32.mrb[14].mxu1  ;;  %v2115_v56 = vadd.f32 %v2550_v62, %v3642_v25  ;;  %v2552_v36 = vadd.f32 %v2056_v51, %v1178_v47 }
 0x16a   :  { %v1194_v46 = vpop.f32.mrb[15].mxu1  ;;  %2133 = vst.msk [vmem:[%s3732_s8 + $0x50] sm:$0xff] %vm175_vm1, %v2117_v45  ;;  %v2118_v10 = vadd.f32 %v2551_v43, %v3642_v25 }
 0x16b   :  { %2131 = vst.msk [vmem:[%s3732_s8 + $0x40] sm:$0xff] %vm175_vm1, %v2115_v56  ;;  %v2116_v26 = vadd.f32 %v2552_v36, %v3642_v25 }
 0x16c   :  { %2134 = vst.msk [vmem:[%s3732_s8 + $0x58] sm:$0xff] %vm175_vm1, %v2118_v10 }
 0x16d   :  { %2132 = vst.msk [vmem:[%s3732_s8 + $0x48] sm:$0xff] %vm175_vm1, %v2116_v26  ;;  %v2537_v33 = vpop.f32.mrb[12].mxu0 }
 0x16e   :  { %v2553_v29 = vadd.f32 %v2537_v33, %v2465_v4  ;;  %v2069_v21 = vpop.f32.mrb[13].mxu0 }
 0x16f   :  { %v2554_v63 = vadd.f32 %v2069_v21, %v1191_v24  ;;  %v2538_v53 = vpop.f32.mrb[14].mxu0 }
 0x170   :  { %v2121_v49 = vadd.f32 %v2553_v29, %v3642_v25  ;;  %v2555_v2 = vadd.f32 %v2538_v53, %v2466_v39  ;;  %v2072_v58 = vpop.f32.mrb[15].mxu0 }
 0x171   :  { %v2119_v59 = vadd.f32 %v2554_v63, %v3642_v25  ;;  %v2556_v14 = vadd.f32 %v2072_v58, %v1194_v46 }
 0x172   :  { %2137 = vst.msk [vmem:[%s3732_s8 + $0x70] sm:$0xff] %vm175_vm1, %v2121_v49  ;;  %v2122_v61 = vadd.f32 %v2555_v2, %v3642_v25 }
 0x173   :  { %2135 = vst.msk [vmem:[%s3732_s8 + $0x60] sm:$0xff] %vm175_vm1, %v2119_v59  ;;  %v2120_v3 = vadd.f32 %v2556_v14, %v3642_v25 }
 0x174   :  { %2138 = vst.msk [vmem:[%s3732_s8 + $0x78] sm:$0xff] %vm175_vm1, %v2122_v61 }
 0x175   :  { %2136 = vst.msk [vmem:[%s3732_s8 + $0x68] sm:$0xff] %vm175_vm1, %v2120_v3 }

</bundles_post_ra>
